<compile_context>
chip_gen: v5e
topology: v5e:2x2
jax: 0.10.0
libtpu: 0.0.40
codegen_flags: <defaults>
</compile_context>

<pallas_src>
from functools import partial

import jax
import jax.numpy as jnp
from jax.experimental import pallas as pl
from jax.experimental.pallas import tpu as pltpu


_VMEM_BUDGET = 24 * 1024 * 1024   # conservative: v7x has 64 MiB physical VMEM
_VMEM_LIMIT = 30 * 1024 * 1024    # explicit scoped-VMEM limit (v5e default: 16 MiB)


def _round_down(x, m):
    return (x // m) * m


def _round_up(x, m):
    return ((x + m - 1) // m) * m


def _sublane_multiple(dtype):
    """Packed sublane tile per dtype: 8 (4-byte), 16 (2-byte), 32 (1-byte)."""
    return {4: 8, 2: 16, 1: 32}.get(jnp.dtype(dtype).itemsize, 8)


def _fused_per_channel_bytes(B, HW, itemsize):
    # double-buffered input slab + double-buffered output slab + ~4 f32 temps
    return B * HW * (4 * itemsize + 4 * 4)


# --------------------------------------------------------------------------
# Fused single-pass kernel: whole (B, c_tile, HW) channel slab resident in VMEM.
# --------------------------------------------------------------------------
def _make_fused_kernel(eps, inv_n):
    def kernel(x_ref, alpha_ref, beta_ref, y_ref, mean_ref, var_ref):
        x = x_ref[...].astype(jnp.float32)                         # (B, c_tile, HW)
        # per-channel mean over batch + spatial (exact, two-pass in VMEM)
        mean = jnp.sum(jnp.sum(x, axis=0), axis=-1, keepdims=True) * inv_n   # (c_tile,1)
        diff = x - mean                                            # broadcast over B, lanes
        var = jnp.sum(jnp.sum(diff * diff, axis=0), axis=-1, keepdims=True) * inv_n
        var = jnp.maximum(var, 0.0)
        scale = alpha_ref[...].astype(jnp.float32) * jax.lax.rsqrt(var + eps)  # EUP
        y_ref[...] = (diff * scale + beta_ref[...].astype(jnp.float32)).astype(y_ref.dtype)
        mean_ref[...] = mean
        var_ref[...] = var

    return kernel


def _batchnorm_fused(x3, alpha2, beta2, eps, sub):
    B, C, HW = x3.shape
    in_item = jnp.dtype(x3.dtype).itemsize
    inv_n = 1.0 / float(B * HW)
    per_c = _fused_per_channel_bytes(B, HW, in_item)

    if C <= sub:
        c_tile = C                       # block dim == full dim is always legal
    else:
        c_tile = _round_down(min(C, max(sub, _VMEM_BUDGET // per_c)), sub)
        if C >= 2 * sub:
            # leave >= 2 C-tile trips so v7x can split the grid across both TCs
            c_tile = min(c_tile, max(sub, _round_up((C + 1) // 2, sub)))
    num_c = pl.cdiv(C, c_tile)

    x_spec = pl.BlockSpec((B, c_tile, HW), lambda c: (0, c, 0))
    chan_spec = pl.BlockSpec((c_tile, 1), lambda c: (c, 0))

    y3, mean2d, var2d = pl.pallas_call(
        _make_fused_kernel(eps, inv_n),
        out_shape=(
            jax.ShapeDtypeStruct((B, C, HW), x3.dtype),
            jax.ShapeDtypeStruct((C, 1), jnp.float32),
            jax.ShapeDtypeStruct((C, 1), jnp.float32),
        ),
        grid_spec=pltpu.PrefetchScalarGridSpec(
            num_scalar_prefetch=0,
            grid=(num_c,),
            in_specs=[x_spec, chan_spec, chan_spec],
            out_specs=[x_spec, chan_spec, chan_spec],
        ),
        compiler_params=pltpu.CompilerParams(
            dimension_semantics=("parallel",),
            vmem_limit_bytes=_VMEM_LIMIT),
        cost_estimate=pl.CostEstimate(
            flops=int(7 * B * C * HW),
            transcendentals=int(C),
            bytes_accessed=int(2 * B * C * HW * in_item)),
    )(x3, alpha2, beta2)
    return y3, mean2d, var2d


# --------------------------------------------------------------------------
# Streaming 2-pass fallback (slab does not fit VMEM).
# --------------------------------------------------------------------------
def _make_stats_kernel(eps, inv_n, hw, hw_tile, needs_hw_mask):
    """Pass 1: per-channel sum / sum-of-squares -> scale, shift, mean, var."""

    def kernel(x_ref, alpha_ref, beta_ref,
               scale_ref, shift_ref, mean_ref, var_ref,
               sum_acc, sq_acc):
        b = pl.program_id(1)
        h = pl.program_id(2)
        is_first = (b == 0) & (h == 0)
        is_last = (b == pl.num_programs(1) - 1) & (h == pl.num_programs(2) - 1)

        @pl.when(is_first)
        def _():
            sum_acc[...] = jnp.zeros_like(sum_acc)
            sq_acc[...] = jnp.zeros_like(sq_acc)

        x = x_ref[0].astype(jnp.float32)                       # (c_tile, hw_tile)
        if needs_hw_mask:
            lane = jax.lax.broadcasted_iota(jnp.int32, x.shape, 1)
            x = jnp.where(h * hw_tile + lane < hw, x, 0.0)     # mask ragged HW tail
        sum_acc[...] += jnp.sum(x, axis=-1, keepdims=True)     # (c_tile, 1)
        sq_acc[...] += jnp.sum(x * x, axis=-1, keepdims=True)  # (c_tile, 1)

        @pl.when(is_last)
        def _():
            mean = sum_acc[...] * inv_n
            var = jnp.maximum(sq_acc[...] * inv_n - mean * mean, 0.0)  # clamp cancellation
            inv_std = jax.lax.rsqrt(var + eps)
            scale = alpha_ref[...].astype(jnp.float32) * inv_std
            scale_ref[...] = scale
            shift_ref[...] = beta_ref[...].astype(jnp.float32) - mean * scale
            mean_ref[...] = mean
            var_ref[...] = var

    return kernel


def _normalize_kernel(x_ref, scale_ref, shift_ref, o_ref):
    """Pass 2: y = x * scale + shift (per channel), lane-dense stores."""
    x = x_ref[...].astype(jnp.float32)                # (1, c_tile, hw_tile)
    o_ref[...] = (x * scale_ref[...] + shift_ref[...]).astype(o_ref.dtype)


def _batchnorm_two_pass(x3, alpha2, beta2, eps, sub, target_block_bytes):
    B, C, HW = x3.shape
    in_item = jnp.dtype(x3.dtype).itemsize
    inv_n = 1.0 / float(B * HW)

    # channel tile: dtype-aware sublane multiple (or full C when C is small)
    c_tile = C if C <= sub else min(256, _round_down(C, sub))
    # lane tile: aim at ~target_block_bytes x-blocks, multiple of 128
    want = max(128, target_block_bytes // max(1, c_tile * in_item))
    if HW <= want or HW < 128:
        hw_tile = HW                                   # full dim: always legal
    else:
        hw_tile = max(128, min(_round_down(want, 128), 8192))
    needs_hw_mask = (HW % hw_tile) != 0

    grid = (pl.cdiv(C, c_tile), B, pl.cdiv(HW, hw_tile))

    x_spec = pl.BlockSpec((1, c_tile, hw_tile), lambda c, b, h: (b, c, h))
    chan_spec = pl.BlockSpec((c_tile, 1), lambda c, b, h: (c, 0))

    # ---- Pass 1: per-channel statistics -> scale / shift (and mean / var). ----
    scale, shift, mean2d, var2d = pl.pallas_call(
        _make_stats_kernel(eps, inv_n, HW, hw_tile, needs_hw_mask),
        out_shape=(jax.ShapeDtypeStruct((C, 1), jnp.float32),) * 4,
        grid_spec=pltpu.PrefetchScalarGridSpec(
            num_scalar_prefetch=0,
            grid=grid,
            in_specs=[x_spec, chan_spec, chan_spec],
            out_specs=[chan_spec] * 4,
            scratch_shapes=[
                pltpu.VMEM((c_tile, 1), jnp.float32),   # sum(x)
                pltpu.VMEM((c_tile, 1), jnp.float32),   # sum(x*x)
            ],
        ),
        compiler_params=pltpu.CompilerParams(
            dimension_semantics=("parallel", "arbitrary", "arbitrary"),
            vmem_limit_bytes=_VMEM_LIMIT),
        cost_estimate=pl.CostEstimate(
            flops=int(3 * B * C * HW),
            transcendentals=int(C),
            bytes_accessed=int(B * C * HW * in_item)),
    )(x3, alpha2, beta2)

    # ---- Pass 2: stream x again and apply y = x * scale + shift. ----
    y3 = pl.pallas_call(
        _normalize_kernel,
        out_shape=jax.ShapeDtypeStruct((B, C, HW), x3.dtype),
        grid_spec=pltpu.PrefetchScalarGridSpec(
            num_scalar_prefetch=0,
            grid=grid,
            in_specs=[x_spec, chan_spec, chan_spec],
            out_specs=x_spec,
        ),
        compiler_params=pltpu.CompilerParams(
            dimension_semantics=("parallel", "parallel", "parallel"),
            vmem_limit_bytes=_VMEM_LIMIT),
        cost_estimate=pl.CostEstimate(
            flops=int(2 * B * C * HW),
            transcendentals=0,
            bytes_accessed=int(2 * B * C * HW * in_item)),
    )(x3, scale, shift)
    return y3, mean2d, var2d


# --------------------------------------------------------------------------
# Public wrapper.
# --------------------------------------------------------------------------
@partial(jax.jit, static_argnames=("eps", "fuse", "two_pass_block_bytes"))
def batchnorm_forward(x_nchw, alpha, beta, eps=1e-5, fuse=None,
                      two_pass_block_bytes=2 * 1024 * 1024):
    """x_nchw: (B, C, H, W); alpha/beta: (C, 1, 1).
    Returns (y, batch_mean, batch_var) with mean/var shaped (C, 1, 1)."""
    B, C, H, W = x_nchw.shape
    HW = H * W

    # Free layout change (no transpose, no extra HBM traffic): channels on
    # sublanes, H*W on lanes -> lane-dense loads/stores.
    x3 = x_nchw.reshape(B, C, HW)
    alpha2 = alpha.reshape(C, 1).astype(jnp.float32)
    beta2 = beta.reshape(C, 1).astype(jnp.float32)

    sub = _sublane_multiple(x3.dtype)
    in_item = jnp.dtype(x3.dtype).itemsize
    min_c = C if C <= sub else sub
    fused_ok = _fused_per_channel_bytes(B, HW, in_item) * min_c <= _VMEM_BUDGET
    use_fused = fused_ok if fuse is None else (bool(fuse) and fused_ok)

    if use_fused:
        y3, mean2d, var2d = _batchnorm_fused(x3, alpha2, beta2, eps, sub)
    else:
        y3, mean2d, var2d = _batchnorm_two_pass(x3, alpha2, beta2, eps, sub,
                                                two_pass_block_bytes)

    return (y3.reshape(B, C, H, W),
            mean2d.reshape(C, 1, 1),
            var2d.reshape(C, 1, 1))


def running_stats_update(batch_mean, batch_var, running_mean, running_var,
                         momentum=0.1):
    """Side effect of the module's forward (does not affect the returned tensor).
    NOTE: this custom module mixes the *biased* batch variance into its `std`
    buffer (unlike torch.nn.BatchNorm2d's unbiased update) — we match the spec."""
    new_mean = momentum * batch_mean + (1.0 - momentum) * running_mean
    new_var = momentum * batch_var + (1.0 - momentum) * running_var
    return new_mean, new_var


if __name__ == "__main__":
    def ref_forward(x, alpha, beta, eps):
        mean = jnp.mean(x, axis=(0, 2, 3), keepdims=True)
        var = jnp.mean((x - mean) ** 2, axis=(0, 2, 3), keepdims=True)
        y = (x - mean) / jnp.sqrt(var + eps) * alpha + beta
        return y, mean.reshape(-1), var.reshape(-1)

    key = jax.random.PRNGKey(0)
    k1, k2 = jax.random.split(key)

    # --- Test 1: module-sized shapes -> fused single-pass path. ---
    B, C, H, W = 2, 4, 16, 16
    x = jax.random.normal(k1, (B, C, H, W), dtype=jnp.float32) * 3.0 + 2.0
    alpha = jnp.ones((C, 1, 1), dtype=jnp.float32)     # module init: alpha=1
    beta = jnp.zeros((C, 1, 1), dtype=jnp.float32)     # module init: beta=0

    y, bmean, bvar = batchnorm_forward(x, alpha, beta, eps=1e-5)
    y = jax.block_until_ready(y)
    y_ref, m_ref, v_ref = ref_forward(x, alpha, beta, 1e-5)
    assert y.shape == (B, C, H, W)
    assert jnp.allclose(y, y_ref, atol=1e-3, rtol=1e-3)
    assert jnp.allclose(bmean.reshape(-1), m_ref, atol=1e-3, rtol=1e-3)
    assert jnp.allclose(bvar.reshape(-1), v_ref, atol=1e-3, rtol=1e-3)

    # Buffer-update side effect (uses kernel-produced stats; no extra pass over x).
    running_mean = jnp.zeros((C, 1, 1), jnp.float32)
    running_var = jnp.ones((C, 1, 1), jnp.float32)
    running_mean, running_var = running_stats_update(bmean, bvar,
                                                     running_mean, running_var)
    jax.block_until_ready((running_mean, running_var))

    # --- Test 2: force the streaming 2-pass fallback (ragged C and H*W). ---
    B2, C2, H2, W2 = 2, 12, 10, 30          # HW = 300, not a multiple of 128
    x2 = jax.random.normal(k2, (B2, C2, H2, W2), dtype=jnp.float32) * 2.0 + 5.0
    alpha_b = jnp.full((C2, 1, 1), 1.5, dtype=jnp.float32)
    beta_b = jnp.full((C2, 1, 1), -0.5, dtype=jnp.float32)
    y2, m2, v2 = batchnorm_forward(x2, alpha_b, beta_b, eps=1e-5, fuse=False,
                                   two_pass_block_bytes=8 * 1024)
    y2 = jax.block_until_ready(y2)
    y2_ref, m2_ref, v2_ref = ref_forward(x2, alpha_b, beta_b, 1e-5)
    assert jnp.allclose(y2, y2_ref, atol=1e-3, rtol=1e-3)
    assert jnp.allclose(m2.reshape(-1), m2_ref, atol=1e-3, rtol=1e-3)
    assert jnp.allclose(v2.reshape(-1), v2_ref, atol=1e-3, rtol=1e-3)

    print("KERNEL_OK")
</pallas_src>

<mosaic_0001>
module attributes {stable_mosaic.version = 11 : i64} {
  func.func @kernel(%arg0: i32, %arg1: memref<2x4x256xf32, #tpu.memory_space<vmem>>, %arg2: memref<4x1xf32, #tpu.memory_space<vmem>>, %arg3: memref<4x1xf32, #tpu.memory_space<vmem>>, %arg4: memref<2x4x256xf32, #tpu.memory_space<vmem>>, %arg5: memref<4x1xf32, #tpu.memory_space<vmem>>, %arg6: memref<4x1xf32, #tpu.memory_space<vmem>>) attributes {dimension_semantics = [#tpu.dimension_semantics<parallel>], iteration_bounds = array<i64: 1>, scalar_prefetch = 0 : i64, scratch_operands = 0 : i64, tpu.core_type = #tpu.core_type<tc>, window_params = [{transform_indices = @transform_0, window_bounds = array<i64: 2, 4, 256>}, {transform_indices = @transform_1, window_bounds = array<i64: 4, 1>}, {transform_indices = @transform_2, window_bounds = array<i64: 4, 1>}, {transform_indices = @transform_3, window_bounds = array<i64: 2, 4, 256>}, {transform_indices = @transform_4, window_bounds = array<i64: 4, 1>}, {transform_indices = @transform_5, window_bounds = array<i64: 4, 1>}]} {
    %c0 = arith.constant 0 : index
    %c0_0 = arith.constant 0 : index
    %c0_1 = arith.constant 0 : index
    %0 = vector.load %arg1[%c0, %c0_0, %c0_1] : memref<2x4x256xf32, #tpu.memory_space<vmem>>, vector<2x4x256xf32>
    %cst = arith.constant dense<0.000000e+00> : vector<4x256xf32>
    %1 = vector.multi_reduction <add>, %0, %cst [0] : vector<2x4x256xf32> to vector<4x256xf32>
    %cst_2 = arith.constant dense<0.000000e+00> : vector<4xf32>
    %2 = vector.multi_reduction <add>, %1, %cst_2 [1] : vector<4x256xf32> to vector<4xf32>
    %3 = vector.shape_cast %2 : vector<4xf32> to vector<4x1xf32>
    %cst_3 = arith.constant 0.001953125 : f32
    %4 = vector.broadcast %cst_3 : f32 to vector<4x1xf32>
    %5 = arith.mulf %3, %4 : vector<4x1xf32>
    %6 = vector.shape_cast %5 : vector<4x1xf32> to vector<1x4x1xf32>
    %7 = vector.broadcast %6 : vector<1x4x1xf32> to vector<2x4x256xf32>
    %8 = arith.subf %0, %7 : vector<2x4x256xf32>
    %9 = arith.mulf %8, %8 : vector<2x4x256xf32>
    %cst_4 = arith.constant dense<0.000000e+00> : vector<4x256xf32>
    %10 = vector.multi_reduction <add>, %9, %cst_4 [0] : vector<2x4x256xf32> to vector<4x256xf32>
    %cst_5 = arith.constant dense<0.000000e+00> : vector<4xf32>
    %11 = vector.multi_reduction <add>, %10, %cst_5 [1] : vector<4x256xf32> to vector<4xf32>
    %12 = vector.shape_cast %11 : vector<4xf32> to vector<4x1xf32>
    %cst_6 = arith.constant 0.001953125 : f32
    %13 = vector.broadcast %cst_6 : f32 to vector<4x1xf32>
    %14 = arith.mulf %12, %13 : vector<4x1xf32>
    %cst_7 = arith.constant 0.000000e+00 : f32
    %15 = vector.broadcast %cst_7 : f32 to vector<4x1xf32>
    %16 = arith.maximumf %14, %15 : vector<4x1xf32>
    %c0_8 = arith.constant 0 : index
    %c0_9 = arith.constant 0 : index
    %17 = vector.load %arg2[%c0_8, %c0_9] : memref<4x1xf32, #tpu.memory_space<vmem>>, vector<4x1xf32>
    %cst_10 = arith.constant 9.99999974E-6 : f32
    %18 = vector.broadcast %cst_10 : f32 to vector<4x1xf32>
    %19 = arith.addf %16, %18 : vector<4x1xf32>
    %20 = math.rsqrt %19 : vector<4x1xf32>
    %21 = arith.mulf %17, %20 : vector<4x1xf32>
    %22 = vector.shape_cast %21 : vector<4x1xf32> to vector<1x4x1xf32>
    %23 = vector.broadcast %22 : vector<1x4x1xf32> to vector<2x4x256xf32>
    %24 = arith.mulf %8, %23 : vector<2x4x256xf32>
    %c0_11 = arith.constant 0 : index
    %c0_12 = arith.constant 0 : index
    %25 = vector.load %arg3[%c0_11, %c0_12] : memref<4x1xf32, #tpu.memory_space<vmem>>, vector<4x1xf32>
    %26 = vector.shape_cast %25 : vector<4x1xf32> to vector<1x4x1xf32>
    %27 = vector.broadcast %26 : vector<1x4x1xf32> to vector<2x4x256xf32>
    %28 = arith.addf %24, %27 : vector<2x4x256xf32>
    %c0_13 = arith.constant 0 : index
    %c0_14 = arith.constant 0 : index
    %c0_15 = arith.constant 0 : index
    %29 = vector.load %arg4[%c0_13, %c0_14, %c0_15] : memref<2x4x256xf32, #tpu.memory_space<vmem>>, vector<2x4x256xf32>
    tpu.vector_store %arg4[%c0_13, %c0_14, %c0_15], %28 {strides = array<i32>} : memref<2x4x256xf32, #tpu.memory_space<vmem>>, vector<2x4x256xf32>,
    %c0_16 = arith.constant 0 : index
    %c0_17 = arith.constant 0 : index
    %30 = vector.load %arg5[%c0_16, %c0_17] : memref<4x1xf32, #tpu.memory_space<vmem>>, vector<4x1xf32>
    tpu.vector_store %arg5[%c0_16, %c0_17], %5 {strides = array<i32>} : memref<4x1xf32, #tpu.memory_space<vmem>>, vector<4x1xf32>,
    %c0_18 = arith.constant 0 : index
    %c0_19 = arith.constant 0 : index
    %31 = vector.load %arg6[%c0_18, %c0_19] : memref<4x1xf32, #tpu.memory_space<vmem>>, vector<4x1xf32>
    tpu.vector_store %arg6[%c0_18, %c0_19], %16 {strides = array<i32>} : memref<4x1xf32, #tpu.memory_space<vmem>>, vector<4x1xf32>,
    return
  }
  func.func @transform_0(%arg0: i32) -> (i32, i32, i32) {
    %c0_i32 = arith.constant 0 : i32
    %c0_i32_0 = arith.constant 0 : i32
    %c0_i32_1 = arith.constant 0 : i32
    return %c0_i32, %arg0, %c0_i32_0 : i32, i32, i32
  }
  func.func @transform_1(%arg0: i32) -> (i32, i32) {
    %c0_i32 = arith.constant 0 : i32
    %c0_i32_0 = arith.constant 0 : i32
    return %arg0, %c0_i32 : i32, i32
  }
  func.func @transform_2(%arg0: i32) -> (i32, i32) {
    %c0_i32 = arith.constant 0 : i32
    %c0_i32_0 = arith.constant 0 : i32
    return %arg0, %c0_i32 : i32, i32
  }
  func.func @transform_3(%arg0: i32) -> (i32, i32, i32) {
    %c0_i32 = arith.constant 0 : i32
    %c0_i32_0 = arith.constant 0 : i32
    %c0_i32_1 = arith.constant 0 : i32
    return %c0_i32, %arg0, %c0_i32_0 : i32, i32, i32
  }
  func.func @transform_4(%arg0: i32) -> (i32, i32) {
    %c0_i32 = arith.constant 0 : i32
    %c0_i32_0 = arith.constant 0 : i32
    return %arg0, %c0_i32 : i32, i32
  }
  func.func @transform_5(%arg0: i32) -> (i32, i32) {
    %c0_i32 = arith.constant 0 : i32
    %c0_i32_0 = arith.constant 0 : i32
    return %arg0, %c0_i32 : i32, i32
  }
}

</mosaic_0001>

<bundles_post_ra>
// kernel: batchnorm_forward.1
= control target key start
LH: loop header
LB: loop body
LE: loop exit
PB: predicated region body
PF: predicated region fallthrough
CT: control target
= control target key end

     0   :  { %vm32_vm0 = vcmask 1043456   ;;  %v140_v15 = vmov 839922192   ;;  %vm119_vm1 = vcmask 3072   ;;  %v141_v38 = vmov 0   ;;  %s210_s0 = inlined_call_operand.vmem [shape: f32[2,4,256], index: 0, kind: input, shape index: {}]   ;;  %s211_s4 = inlined_call_operand.vmem [shape: f32[4,1], index: 4, kind: output, shape index: {1}]   ;;  %s212_s5 = inlined_call_operand.vmem [shape: f32[4,1], index: 5, kind: output, shape index: {2}]   ;;  %s213_s1 = inlined_call_operand.vmem [shape: f32[4,1], index: 1, kind: input, shape index: {}]   ;;  %s214_s2 = inlined_call_operand.vmem [shape: f32[4,1], index: 2, kind: input, shape index: {}]   ;;  %s215_s3 = inlined_call_operand.vmem [shape: f32[2,4,256], index: 3, kind: output, shape index: {0}]  }
   0x1   :  { %v17_v0 = vld [vmem:[%s210_s0] sm:$0xff]  ;;  %v18_v1 = vld [vmem:[%s210_s0 + $0x8] sm:$0xff]  ;;  %v47_v16 = vunpack.c.l.s4 %v140_v15  ;;  %136 = vset.pattern.permute.xlu1 %v141_v38  ;;  %137 = vset.pattern.permute.xlu0 %v141_v38 }
   0x2   :  { %21 = vst [vmem:[#allocation1] ss:$2 sm:$0xff] %v17_v0  ;;  %v81_v48 = vld [vmem:[%s213_s1] sm:$0xf] }
   0x3   :  { %25 = vst [vmem:[#allocation1 + $0x10] ss:$2 sm:$0xff] %v18_v1  ;;  %v48_v17 = vunpack.c.0.s8 %v47_v16  ;;  %v105_v52 = vld [vmem:[%s214_s2] sm:$0xf] }
   0x9   :  { %v22_v2 = vld.sshfl [vmem:[#allocation1] sm:$0xff pattern:$0x75316420]  ;;  %v23_v3 = vld.sshfl [vmem:[#allocation1 + $0x8] sm:$0xff pattern:$0x75316420] }
   0xa   :  { %v26_v4 = vld.sshfl [vmem:[#allocation1 + $0x10] sm:$0xff pattern:$0x75316420]  ;;  %v27_v5 = vld.sshfl [vmem:[#allocation1 + $0x18] sm:$0xff pattern:$0x75316420] }
   0xb   :  { %v33_v6 = vsel %vm32_vm0, %v22_v2, 0.0  ;;  %v34_v7 = vsel %vm32_vm0, %v26_v4, 0.0  ;;  %v36_v8 = vsel %vm32_vm0, %v23_v3, 0.0  ;;  %v37_v9 = vsel %vm32_vm0, %v27_v5, 0.0 }
   0xc   :  { %v35_v10 = vadd.f32 %v34_v7, %v33_v6  ;;  %v38_v11 = vadd.f32 %v37_v9, %v36_v8 }
   0xe   :  { %v39_v12 = vsel %vm32_vm0, %v35_v10, 0.0  ;;  %v40_v13 = vsel %vm32_vm0, %v38_v11, 0.0 }
   0xf   :  { %v41_v14 = vadd.f32 %v40_v13, %v39_v12 }
  0x11   :  { %42 = vadd.xlane.f32.xlu0 %v41_v14 }
  0x84   :  { %v43_v18 = vpop.xlane.xlu0 %42 }
  0x85   :  { %v44_v19 = vmul.f32 0.001953125, %v43_v18 }
  0x87   :  { %v49_v20 = vperm.slane %v44_v19, %v48_v17  ;;  %120 = vst.msk [vmem:[%s211_s4] sm:$0xf] %vm119_vm1, %v44_v19 }
  0x89   :  { %v51_v21 = vsub.f32 %v17_v0, %v49_v20  ;;  %v52_v22 = vsub.f32 %v18_v1, %v49_v20 }
  0x8b   :  { %v53_v23 = vmul.f32 %v51_v21, %v51_v21  ;;  %v54_v24 = vmul.f32 %v52_v22, %v52_v22 }
  0x8d   :  { %57 = vst [vmem:[#allocation1] ss:$2 sm:$0xff] %v53_v23 }
  0x8e   :  { %61 = vst [vmem:[#allocation1 + $0x10] ss:$2 sm:$0xff] %v54_v24 }
  0x94   :  { %v58_v25 = vld.sshfl [vmem:[#allocation1] sm:$0xff pattern:$0x75316420]  ;;  %v59_v26 = vld.sshfl [vmem:[#allocation1 + $0x8] sm:$0xff pattern:$0x75316420] }
  0x95   :  { %v62_v27 = vld.sshfl [vmem:[#allocation1 + $0x10] sm:$0xff pattern:$0x75316420]  ;;  %v63_v28 = vld.sshfl [vmem:[#allocation1 + $0x18] sm:$0xff pattern:$0x75316420] }
  0x96   :  { %v68_v29 = vsel %vm32_vm0, %v58_v25, 0.0  ;;  %v69_v30 = vsel %vm32_vm0, %v62_v27, 0.0  ;;  %v71_v31 = vsel %vm32_vm0, %v59_v26, 0.0  ;;  %v72_v32 = vsel %vm32_vm0, %v63_v28, 0.0 }
  0x97   :  { %v70_v33 = vadd.f32 %v69_v30, %v68_v29  ;;  %v73_v34 = vadd.f32 %v72_v32, %v71_v31 }
  0x99   :  { %v74_v35 = vsel %vm32_vm0, %v70_v33, 0.0  ;;  %v75_v36 = vsel %vm32_vm0, %v73_v34, 0.0 }
  0x9a   :  { %v76_v37 = vadd.f32 %v75_v36, %v74_v35 }
  0x9c   :  { %77 = vadd.xlane.f32.xlu0 %v76_v37 }
 0x10f   :  { %v78_v39 = vpop.xlane.xlu0 %77 }
 0x110   :  { %v79_v40 = vmul.f32 0.001953125, %v78_v39 }
 0x112   :  { %v80_v41 = vmax.f32 %v79_v40, 0.0 }
 0x114   :  { %v82_v42 = vadd.f32 1e-05, %v80_v41  ;;  %121 = vst.msk [vmem:[%s212_s5] sm:$0xf] %vm119_vm1, %v80_v41 }
 0x116   :  { %138 = vrsqrt.f32 %v82_v42  ;;  %vm89_vm3 = vweird.f32 %v82_v42 }
 0x11c   :  { %v139_v43 = vpop.eup %138 }
 0x11d   :  { %v84_v44 = vmul.f32 %v139_v43, %v82_v42  ;;  %vm90_vm2 = vweird.f32 %v139_v43 }
 0x11e   :  { %vm91_vm4 = vmor %vm89_vm3, %vm90_vm2 }
 0x11f   :  { %v85_v45 = vmul.f32 %v139_v43, %v84_v44 }
 0x121   :  { %v86_v46 = vmul.f32 0.5, %v85_v45 }
 0x123   :  { %v87_v47 = vsub.f32 1.5, %v86_v46 }
 0x125   :  { %v88_v49 = vmul.f32 %v139_v43, %v87_v47 }
 0x127   :  { %v92_v50 = vsel %vm91_vm4, %v139_v43, %v88_v49 }
 0x128   :  { %v93_v51 = vmul.f32 %v92_v50, %v81_v48 }
 0x12a   :  { %96 = vperm.xlu1 %136, %v93_v51  }
 0x132   :  { %108 = vperm.xlu1 %136, %v105_v52  }
 0x19c   :  { %v97_v53 = vpop.permute.xlu1 %96 }
 0x19d   :  { %v101_v54 = vperm.slane %v97_v53, %v48_v17 }
 0x19f   :  { %v103_v56 = vmul.f32 %v101_v54, %v51_v21  ;;  %v104_v57 = vmul.f32 %v101_v54, %v52_v22 }
 0x1a4   :  { %v109_v55 = vpop.permute.xlu1 %108 }
 0x1a5   :  { %v113_v58 = vperm.slane %v109_v55, %v48_v17 }
 0x1a7   :  { %v115_v59 = vadd.f32 %v113_v58, %v103_v56  ;;  %v116_v60 = vadd.f32 %v113_v58, %v104_v57 }
 0x1a9   :  { %117 = vst [vmem:[%s215_s3] sm:$0xff] %v115_v59 }
 0x1aa   :  { %118 = vst [vmem:[%s215_s3 + $0x8] sm:$0xff] %v116_v60 }

</bundles_post_ra>
